<compile_context>
chip_gen: v7x
topology: tpu7x:2x2x1
jax: 0.10.0
libtpu: 0.0.40
codegen_flags: <defaults>
</compile_context>

<pallas_src>
import functools

import jax
import jax.numpy as jnp
from jax import lax
from jax.experimental import pallas as pl
from jax.experimental.pallas import tpu as pltpu


# ------------------------------ tiling helpers --------------------------------

def _sublane_align(dtype):
    """Dtype-aware sublane alignment: 8 rows for 4-byte, 16 for 2-byte, 32 for 1-byte."""
    return max(8, 32 // jnp.dtype(dtype).itemsize)


def _pick_tile(dim, target, align):
    """Largest tile <= target that evenly divides `dim` and is a multiple of
    `align`; falls back to the full dimension (always a legal block)."""
    if dim <= target:
        return dim
    t = (target // align) * align
    while t >= align:
        if dim % t == 0:
            return t
        t -= align
    return dim


def _padded_block_bytes(shape, dtype, sublane=8):
    """VMEM footprint of one block, padded to (sublane, 128) tiles."""
    s = [int(v) for v in shape]
    if len(s) >= 1:
        s[-1] = -(-s[-1] // 128) * 128
    if len(s) >= 2:
        s[-2] = -(-s[-2] // sublane) * sublane
    total = 1
    for v in s:
        total *= max(v, 1)
    return total * jnp.dtype(dtype).itemsize


def _vmem_limit_bytes(block_bytes, scratch_bytes):
    """Scoped-VMEM request from tile arithmetic: double-buffered pipeline blocks
    + resident scratch, 2x headroom, clamped to [32 MiB, 64 MiB] (64 MiB = v7x
    physical VMEM, so the request compiles on every generation)."""
    est = 2 * sum(block_bytes) + sum(scratch_bytes)
    return int(min(max(2 * est, 32 * 1024 * 1024), 64 * 1024 * 1024))


# ------------------------------- kernels --------------------------------------

def _qkv_proj_kernel(x_ref, w_ref, o_ref, acc_ref):
    """Tiled matmul producing the head-major (3, heads, M, d) qkv slab.

    grid = (3, heads, M//tm, K//tk); K (axis 3) is the reduction axis.
    x_ref: (tm, tk), w_ref: (tk, d) (q/k/v + head axes squeezed),
    o_ref: (1, 1, tm, d), acc_ref: (tm, d) f32 scratch.
    """
    @pl.when(pl.program_id(3) == 0)
    def _():
        acc_ref[...] = jnp.zeros(acc_ref.shape, acc_ref.dtype)

    acc_ref[...] += jnp.dot(x_ref[...], w_ref[...],
                            preferred_element_type=jnp.float32)

    @pl.when(pl.program_id(3) == pl.num_programs(3) - 1)
    def _():
        o_ref[0, 0] = acc_ref[...].astype(o_ref.dtype)


def _flash_attn_kernel(q_ref, k_ref, v_ref, o_ref, m_ref, l_ref, acc_ref):
    """Flash-attention step for one (batch, head, q-tile, kv-tile) grid point.

    q_ref: (qt, d), k_ref/v_ref: (kt, d), o_ref: (1, 1, qt, d).
    Scratch: m_ref/l_ref (qt, 1) running max / denom, acc_ref (qt, d) f32.
    The softmax scale is already folded into the q weights.
    """
    ki = pl.program_id(3)

    @pl.when(ki == 0)
    def _():
        m_ref[...] = jnp.full(m_ref.shape, -jnp.inf, dtype=m_ref.dtype)
        l_ref[...] = jnp.zeros(l_ref.shape, l_ref.dtype)
        acc_ref[...] = jnp.zeros(acc_ref.shape, acc_ref.dtype)

    q = q_ref[...]                                     # (qt, d)
    k = k_ref[...]                                     # (kt, d)
    v = v_ref[...]                                     # (kt, d)

    # scores (qt, kt): kt is the 128-aligned lane dim, f32 MXU accumulation.
    s = lax.dot_general(q, k, (((1,), (1,)), ((), ())),
                        preferred_element_type=jnp.float32)

    m_prev = m_ref[...]                                # (qt, 1)
    m_new = jnp.maximum(m_prev, jnp.max(s, axis=-1, keepdims=True))
    alpha = jnp.exp(m_prev - m_new)
    p = jnp.exp(s - m_new)                             # (qt, kt)

    l_ref[...] = alpha * l_ref[...] + jnp.sum(p, axis=-1, keepdims=True)
    pv = jnp.dot(p.astype(v.dtype), v,
                 preferred_element_type=jnp.float32)   # (qt, d)
    acc_ref[...] = alpha * acc_ref[...] + pv           # single whole-ref store
    m_ref[...] = m_new

    @pl.when(ki == pl.num_programs(3) - 1)
    def _():
        # Deferred normalization folded straight into the output store:
        # one EUP reciprocal (+ Newton step for ~f32 accuracy), no acc RMW.
        l = l_ref[...]
        inv = pl.reciprocal(l, approx=True)
        inv = inv * (2.0 - l * inv)
        o_ref[0, 0] = (acc_ref[...] * inv).astype(o_ref.dtype)


def _out_proj_kernel(x_ref, w_ref, b_ref, o_ref, acc_ref):
    """Output projection with `heads` folded into the reduction axis.

    grid = (b, n//tm, dim//tn, heads); heads (axis 3) reduces.
    x_ref: (tm, d) head slice of the attention output, w_ref: (d, tn),
    b_ref: (1, tn), o_ref: (1, tm, tn), acc_ref: (tm, tn) f32 scratch.
    """
    h = pl.program_id(3)

    @pl.when(h == 0)
    def _():
        acc_ref[...] = jnp.zeros(acc_ref.shape, acc_ref.dtype)

    acc_ref[...] += jnp.dot(x_ref[...], w_ref[...],
                            preferred_element_type=jnp.float32)

    @pl.when(h == pl.num_programs(3) - 1)
    def _():
        o_ref[0] = (acc_ref[...] + b_ref[...].astype(jnp.float32)
                    ).astype(o_ref.dtype)


# ------------------------------- wrappers --------------------------------------

def _qkv_projection(x2, w3, *, tm_t=256, tk_t=512):
    """x2: (M, K) activations, w3: (3, heads, K, d) weights -> (3, heads, M, d)."""
    M, K = x2.shape
    _, heads, _, d = w3.shape
    sub = _sublane_align(x2.dtype)
    tm = _pick_tile(M, tm_t, sub)
    tk = _pick_tile(K, tk_t, 128)

    blocks = [
        _padded_block_bytes((tm, tk), x2.dtype, sub),
        _padded_block_bytes((tk, d), w3.dtype, sub),
        _padded_block_bytes((tm, d), x2.dtype, sub),
    ]
    scratch = [_padded_block_bytes((tm, d), jnp.float32)]

    return pl.pallas_call(
        _qkv_proj_kernel,
        out_shape=jax.ShapeDtypeStruct((3, heads, M, d), x2.dtype),
        grid=(3, heads, M // tm, K // tk),
        in_specs=[
            pl.BlockSpec((tm, tk), lambda c, h, i, k: (i, k)),
            pl.BlockSpec((pl.Squeezed(), pl.Squeezed(), tk, d),
                         lambda c, h, i, k: (c, h, k, 0)),
        ],
        out_specs=pl.BlockSpec((1, 1, tm, d), lambda c, h, i, k: (c, h, i, 0)),
        scratch_shapes=[pltpu.VMEM((tm, d), jnp.float32)],
        compiler_params=pltpu.CompilerParams(
            dimension_semantics=("parallel", "parallel", "parallel", "arbitrary"),
            vmem_limit_bytes=_vmem_limit_bytes(blocks, scratch)),
    )(x2, w3)


def _flash_attention(qkv, *, qt_t=512, kt_t=512):
    """qkv: (3, heads, b, n, d) head-major slab -> (b, heads, n, d)."""
    _, heads, b, n, d = qkv.shape
    dtype = qkv.dtype
    sub = _sublane_align(dtype)
    qt = _pick_tile(n, qt_t, sub)
    kt = _pick_tile(n, kt_t, 128)        # lane dim of S/P -> 128-aligned
    nq, nk = n // qt, n // kt

    q_spec = pl.BlockSpec((pl.Squeezed(), pl.Squeezed(), pl.Squeezed(), qt, d),
                          lambda bi, h, qi, ki: (0, h, bi, qi, 0))
    k_spec = pl.BlockSpec((pl.Squeezed(), pl.Squeezed(), pl.Squeezed(), kt, d),
                          lambda bi, h, qi, ki: (1, h, bi, ki, 0))
    v_spec = pl.BlockSpec((pl.Squeezed(), pl.Squeezed(), pl.Squeezed(), kt, d),
                          lambda bi, h, qi, ki: (2, h, bi, ki, 0))
    o_spec = pl.BlockSpec((1, 1, qt, d), lambda bi, h, qi, ki: (bi, h, qi, 0))

    itemsize = jnp.dtype(dtype).itemsize
    # Honest HBM traffic: q + out once per (b, h); k and v re-streamed once per
    # q-tile (nq refetch factor).
    cost = pl.CostEstimate(
        flops=int(4 * b * heads * n * n * d),
        transcendentals=int(b * heads * n * n),
        bytes_accessed=int(itemsize * b * heads * (2 * n * d + 2 * nq * n * d)),
    )

    blocks = [
        _padded_block_bytes((qt, d), dtype, sub),
        _padded_block_bytes((kt, d), dtype, sub),
        _padded_block_bytes((kt, d), dtype, sub),
        _padded_block_bytes((qt, d), dtype, sub),
    ]
    scratch = [
        _padded_block_bytes((qt, 1), jnp.float32),
        _padded_block_bytes((qt, 1), jnp.float32),
        _padded_block_bytes((qt, d), jnp.float32),
        _padded_block_bytes((qt, kt), jnp.float32),   # headroom for S/P temporaries
    ]

    return pl.pallas_call(
        _flash_attn_kernel,
        out_shape=jax.ShapeDtypeStruct((b, heads, n, d), dtype),
        grid=(b, heads, nq, nk),
        in_specs=[q_spec, k_spec, v_spec],
        out_specs=o_spec,
        scratch_shapes=[
            pltpu.VMEM((qt, 1), jnp.float32),   # running max
            pltpu.VMEM((qt, 1), jnp.float32),   # running denom
            pltpu.VMEM((qt, d), jnp.float32),   # un-normalized PV accumulator
        ],
        compiler_params=pltpu.CompilerParams(
            dimension_semantics=("parallel", "parallel", "parallel", "arbitrary"),
            vmem_limit_bytes=_vmem_limit_bytes(blocks, scratch)),
        cost_estimate=cost,
    )(qkv, qkv, qkv)   # same array, three block-views (q / k / v slabs)


def _out_projection(attn, w3, b2, *, tm_t=256, tn_t=512):
    """attn: (b, heads, n, d), w3: (heads, d, N), b2: (1, N) -> (b, n, N).

    Consumes the head-major attention output directly (no HBM transpose):
    y = sum_h attn[:, h] @ w3[h] + b.
    """
    b, heads, n, d = attn.shape
    _, _, N = w3.shape
    sub = _sublane_align(attn.dtype)
    tm = _pick_tile(n, tm_t, sub)
    tn = _pick_tile(N, tn_t, 128)

    blocks = [
        _padded_block_bytes((tm, d), attn.dtype, sub),
        _padded_block_bytes((d, tn), w3.dtype, sub),
        _padded_block_bytes((1, tn), b2.dtype, sub),
        _padded_block_bytes((tm, tn), attn.dtype, sub),
    ]
    scratch = [_padded_block_bytes((tm, tn), jnp.float32)]

    return pl.pallas_call(
        _out_proj_kernel,
        out_shape=jax.ShapeDtypeStruct((b, n, N), attn.dtype),
        grid=(b, n // tm, N // tn, heads),
        in_specs=[
            pl.BlockSpec((pl.Squeezed(), pl.Squeezed(), tm, d),
                         lambda bi, i, j, h: (bi, h, i, 0)),
            pl.BlockSpec((pl.Squeezed(), d, tn), lambda bi, i, j, h: (h, 0, j)),
            pl.BlockSpec((1, tn), lambda bi, i, j, h: (0, j)),
        ],
        out_specs=pl.BlockSpec((1, tm, tn), lambda bi, i, j, h: (bi, i, j)),
        scratch_shapes=[pltpu.VMEM((tm, tn), jnp.float32)],
        compiler_params=pltpu.CompilerParams(
            dimension_semantics=("parallel", "parallel", "parallel", "arbitrary"),
            vmem_limit_bytes=_vmem_limit_bytes(blocks, scratch)),
    )(attn, w3, b2)


# --------------------------- parameter prep + forward --------------------------

def prepare_attention_params(params, *, heads, dim_head):
    """One-time weight plumbing (outside the jitted per-call path):
      * W_qkv (dim, 3*inner) -> head-major (3, heads, dim, d)
      * softmax scale folded into the q slab of the weight
      * W_out (inner, dim)   -> head-major (heads, d, dim)
    """
    dim = params["w_qkv"].shape[0]
    scale = dim_head ** -0.5
    w_qkv = params["w_qkv"].reshape(dim, 3, heads, dim_head).transpose(1, 2, 0, 3)
    w_qkv = w_qkv * jnp.asarray([scale, 1.0, 1.0],
                                dtype=w_qkv.dtype).reshape(3, 1, 1, 1)
    w_out = params["w_out"].reshape(heads, dim_head, dim)
    b_out = params["b_out"].reshape(1, dim)
    return {"w_qkv3": w_qkv, "w_out3": w_out, "b_out2": b_out}


def attention_forward(x, prep):
    """Pallas implementation of kwt.Attention.forward (eval mode)."""
    b, n, dim = x.shape
    _, heads, _, d = prep["w_qkv3"].shape

    x2 = x.reshape(b * n, dim)                          # free reshape
    qkv = _qkv_projection(x2, prep["w_qkv3"])           # (3, heads, b*n, d)
    qkv = qkv.reshape(3, heads, b, n, d)                # free reshape

    out = _flash_attention(qkv)                         # (b, heads, n, d)

    # to_out: Linear(inner, dim) + Dropout(0.0) (identity); heads folded into
    # the reduction axis so no activation transpose is needed.
    return _out_projection(out, prep["w_out3"], prep["b_out2"])


# --------------------------- pure-JAX reference ------------------------------

def attention_reference(x, params, *, heads, dim_head):
    b, n, dim = x.shape
    inner = heads * dim_head
    scale = dim_head ** -0.5
    qkv = x @ params["w_qkv"]
    q, k, v = jnp.split(qkv, 3, axis=-1)

    def rearr(t):
        return jnp.transpose(t.reshape(b, n, heads, dim_head), (0, 2, 1, 3))

    q, k, v = rearr(q), rearr(k), rearr(v)
    dots = jnp.einsum("bhid,bhjd->bhij", q, k) * scale
    attn = jax.nn.softmax(dots, axis=-1)
    out = jnp.einsum("bhij,bhjd->bhid", attn, v)
    out = jnp.transpose(out, (0, 2, 1, 3)).reshape(b, n, inner)
    return out @ params["w_out"] + params["b_out"]


# --------------------------------- main --------------------------------------

if __name__ == "__main__":
    key = jax.random.PRNGKey(0)
    b, n, dim = 2, 8, 32
    heads, dim_head = 4, 16
    inner = heads * dim_head

    k1, k2, k3, k4 = jax.random.split(key, 4)
    x = jax.random.normal(k1, (b, n, dim), dtype=jnp.float32)
    # Shapes match nn.Linear(dim, 3*inner, bias=False) / nn.Linear(inner, dim),
    # stored as (in, out) so the forward is x @ W.
    params = {
        "w_qkv": jax.random.normal(k2, (dim, 3 * inner), jnp.float32) * (dim ** -0.5),
        "w_out": jax.random.normal(k3, (inner, dim), jnp.float32) * (inner ** -0.5),
        "b_out": jax.random.normal(k4, (dim,), jnp.float32) * 0.01,
    }

    # One-time parameter prep (reshape/transpose + scale folding) outside jit.
    prep = prepare_attention_params(params, heads=heads, dim_head=dim_head)

    fwd = jax.jit(attention_forward)
    y = fwd(x, prep)
    y = jax.block_until_ready(y)

    y_ref = attention_reference(x, params, heads=heads, dim_head=dim_head)
    assert y.shape == (b, n, dim)
    # Tolerance covers the online-softmax reordering and the Newton-refined
    # EUP approximate reciprocal (all other math is f32 here).
    assert jnp.allclose(y, y_ref, atol=1e-3, rtol=1e-3), "mismatch vs reference"

    print("KERNEL_OK")
</pallas_src>

<mosaic_0001>
module attributes {stable_mosaic.version = 11 : i64} {
  func.func @_flash_attn_kernel(%arg0: i32, %arg1: i32, %arg2: i32, %arg3: i32, %arg4: memref<1x1x1x8x16xf32, #tpu.memory_space<vmem>>, %arg5: memref<1x1x1x8x16xf32, #tpu.memory_space<vmem>>, %arg6: memref<1x1x1x8x16xf32, #tpu.memory_space<vmem>>, %arg7: memref<1x1x8x16xf32, #tpu.memory_space<vmem>>, %arg8: memref<8x1xf32, #tpu.memory_space<vmem>>, %arg9: memref<8x1xf32, #tpu.memory_space<vmem>>, %arg10: memref<8x16xf32, #tpu.memory_space<vmem>>) attributes {dimension_semantics = [#tpu.dimension_semantics<parallel>, #tpu.dimension_semantics<parallel>, #tpu.dimension_semantics<parallel>, #tpu.dimension_semantics<arbitrary>], iteration_bounds = array<i64: 2, 4, 1, 1>, scalar_prefetch = 0 : i64, scratch_operands = 3 : i64, tpu.core_type = #tpu.core_type<tc>, window_params = [{transform_indices = @transform_0, window_bounds = array<i64: 1, 1, 1, 8, 16>}, {transform_indices = @transform_1, window_bounds = array<i64: 1, 1, 1, 8, 16>}, {transform_indices = @transform_2, window_bounds = array<i64: 1, 1, 1, 8, 16>}, {transform_indices = @transform_3, window_bounds = array<i64: 1, 1, 8, 16>}]} {
    %c0_i32 = arith.constant 0 : i32
    %0 = arith.cmpi eq, %arg3, %c0_i32 : i32
    %1 = arith.extui %0 : i1 to i32
    %c0_i32_0 = arith.constant 0 : i32
    %2 = arith.cmpi ne, %1, %c0_i32_0 : i32
    scf.if %2 {
      %cst_32 = arith.constant 0xFF800000 : f32
      %35 = vector.broadcast %cst_32 : f32 to vector<8x1xf32>
      %c0_33 = arith.constant 0 : index
      %c0_34 = arith.constant 0 : index
      %36 = vector.load %arg8[%c0_33, %c0_34] : memref<8x1xf32, #tpu.memory_space<vmem>>, vector<8x1xf32>
      tpu.vector_store %arg8[%c0_33, %c0_34], %35 {strides = array<i32>} : memref<8x1xf32, #tpu.memory_space<vmem>>, vector<8x1xf32>,
      %cst_35 = arith.constant 0.000000e+00 : f32
      %37 = vector.broadcast %cst_35 : f32 to vector<8x1xf32>
      %c0_36 = arith.constant 0 : index
      %c0_37 = arith.constant 0 : index
      %38 = vector.load %arg9[%c0_36, %c0_37] : memref<8x1xf32, #tpu.memory_space<vmem>>, vector<8x1xf32>
      tpu.vector_store %arg9[%c0_36, %c0_37], %37 {strides = array<i32>} : memref<8x1xf32, #tpu.memory_space<vmem>>, vector<8x1xf32>,
      %cst_38 = arith.constant 0.000000e+00 : f32
      %39 = vector.broadcast %cst_38 : f32 to vector<8x16xf32>
      %c0_39 = arith.constant 0 : index
      %c0_40 = arith.constant 0 : index
      %40 = vector.load %arg10[%c0_39, %c0_40] : memref<8x16xf32, #tpu.memory_space<vmem>>, vector<8x16xf32>
      tpu.vector_store %arg10[%c0_39, %c0_40], %39 {strides = array<i32>} : memref<8x16xf32, #tpu.memory_space<vmem>>, vector<8x16xf32>,
    } else {
    }
    %c0 = arith.constant 0 : index
    %c0_1 = arith.constant 0 : index
    %c0_2 = arith.constant 0 : index
    %c0_3 = arith.constant 0 : index
    %c0_4 = arith.constant 0 : index
    %3 = vector.load %arg4[%c0, %c0_1, %c0_2, %c0_3, %c0_4] : memref<1x1x1x8x16xf32, #tpu.memory_space<vmem>>, vector<1x1x1x8x16xf32>
    %4 = vector.shape_cast %3 : vector<1x1x1x8x16xf32> to vector<8x16xf32>
    %c0_5 = arith.constant 0 : index
    %c0_6 = arith.constant 0 : index
    %c0_7 = arith.constant 0 : index
    %c0_8 = arith.constant 0 : index
    %c0_9 = arith.constant 0 : index
    %5 = vector.load %arg5[%c0_5, %c0_6, %c0_7, %c0_8, %c0_9] : memref<1x1x1x8x16xf32, #tpu.memory_space<vmem>>, vector<1x1x1x8x16xf32>
    %6 = vector.shape_cast %5 : vector<1x1x1x8x16xf32> to vector<8x16xf32>
    %c0_10 = arith.constant 0 : index
    %c0_11 = arith.constant 0 : index
    %c0_12 = arith.constant 0 : index
    %c0_13 = arith.constant 0 : index
    %c0_14 = arith.constant 0 : index
    %7 = vector.load %arg6[%c0_10, %c0_11, %c0_12, %c0_13, %c0_14] : memref<1x1x1x8x16xf32, #tpu.memory_space<vmem>>, vector<1x1x1x8x16xf32>
    %8 = vector.shape_cast %7 : vector<1x1x1x8x16xf32> to vector<8x16xf32>
    %cst = arith.constant dense<0.000000e+00> : vector<8x8xf32>
    %9 = tpu.matmul %4, %6, %cst {dimension_numbers = #tpu.dot_dimension_numbers<[1], [1], [0], [0], [0, 0, 1, 0], [], []>} : vector<8x16xf32>, vector<8x16xf32>, vector<8x8xf32> -> vector<8x8xf32>
    %c0_15 = arith.constant 0 : index
    %c0_16 = arith.constant 0 : index
    %10 = vector.load %arg8[%c0_15, %c0_16] : memref<8x1xf32, #tpu.memory_space<vmem>>, vector<8x1xf32>
    %cst_17 = arith.constant dense<0xFF800000> : vector<8xf32>
    %11 = vector.multi_reduction <maximumf>, %9, %cst_17 [1] : vector<8x8xf32> to vector<8xf32>
    %12 = vector.shape_cast %11 : vector<8xf32> to vector<8x1xf32>
    %13 = arith.maximumf %10, %12 : vector<8x1xf32>
    %14 = arith.subf %10, %13 : vector<8x1xf32>
    %15 = math.exp %14 : vector<8x1xf32>
    %16 = vector.broadcast %13 : vector<8x1xf32> to vector<8x8xf32>
    %17 = arith.subf %9, %16 : vector<8x8xf32>
    %18 = math.exp %17 : vector<8x8xf32>
    %c0_18 = arith.constant 0 : index
    %c0_19 = arith.constant 0 : index
    %19 = vector.load %arg9[%c0_18, %c0_19] : memref<8x1xf32, #tpu.memory_space<vmem>>, vector<8x1xf32>
    %20 = arith.mulf %15, %19 : vector<8x1xf32>
    %cst_20 = arith.constant dense<0.000000e+00> : vector<8xf32>
    %21 = vector.multi_reduction <add>, %18, %cst_20 [1] : vector<8x8xf32> to vector<8xf32>
    %22 = vector.shape_cast %21 : vector<8xf32> to vector<8x1xf32>
    %23 = arith.addf %20, %22 : vector<8x1xf32>
    %c0_21 = arith.constant 0 : index
    %c0_22 = arith.constant 0 : index
    %24 = vector.load %arg9[%c0_21, %c0_22] : memref<8x1xf32, #tpu.memory_space<vmem>>, vector<8x1xf32>
    tpu.vector_store %arg9[%c0_21, %c0_22], %23 {strides = array<i32>} : memref<8x1xf32, #tpu.memory_space<vmem>>, vector<8x1xf32>,
    %cst_23 = arith.constant dense<0.000000e+00> : vector<8x16xf32>
    %25 = tpu.matmul %18, %8, %cst_23 {dimension_numbers = #tpu.dot_dimension_numbers<[1], [0], [0], [1], [0, 0, 1, 1], [], []>} : vector<8x8xf32>, vector<8x16xf32>, vector<8x16xf32> -> vector<8x16xf32>
    %c0_24 = arith.constant 0 : index
    %c0_25 = arith.constant 0 : index
    %26 = vector.load %arg10[%c0_24, %c0_25] : memref<8x16xf32, #tpu.memory_space<vmem>>, vector<8x16xf32>
    %27 = vector.broadcast %15 : vector<8x1xf32> to vector<8x16xf32>
    %28 = arith.mulf %27, %26 : vector<8x16xf32>
    %29 = arith.addf %28, %25 : vector<8x16xf32>
    %c0_26 = arith.constant 0 : index
    %c0_27 = arith.constant 0 : index
    %30 = vector.load %arg10[%c0_26, %c0_27] : memref<8x16xf32, #tpu.memory_space<vmem>>, vector<8x16xf32>
    tpu.vector_store %arg10[%c0_26, %c0_27], %29 {strides = array<i32>} : memref<8x16xf32, #tpu.memory_space<vmem>>, vector<8x16xf32>,
    %c0_28 = arith.constant 0 : index
    %c0_29 = arith.constant 0 : index
    %31 = vector.load %arg8[%c0_28, %c0_29] : memref<8x1xf32, #tpu.memory_space<vmem>>, vector<8x1xf32>
    tpu.vector_store %arg8[%c0_28, %c0_29], %13 {strides = array<i32>} : memref<8x1xf32, #tpu.memory_space<vmem>>, vector<8x1xf32>,
    %c0_i32_30 = arith.constant 0 : i32
    %32 = arith.cmpi eq, %arg3, %c0_i32_30 : i32
    %33 = arith.extui %32 : i1 to i32
    %c0_i32_31 = arith.constant 0 : i32
    %34 = arith.cmpi ne, %33, %c0_i32_31 : i32
    scf.if %34 {
      %c0_32 = arith.constant 0 : index
      %c0_33 = arith.constant 0 : index
      %35 = vector.load %arg9[%c0_32, %c0_33] : memref<8x1xf32, #tpu.memory_space<vmem>>, vector<8x1xf32>
      %36 = tpu.reciprocal %35 {approx = true} : vector<8x1xf32> -> vector<8x1xf32>
      %37 = arith.mulf %35, %36 : vector<8x1xf32>
      %cst_34 = arith.constant 2.000000e+00 : f32
      %38 = vector.broadcast %cst_34 : f32 to vector<8x1xf32>
      %39 = arith.subf %38, %37 : vector<8x1xf32>
      %40 = arith.mulf %36, %39 : vector<8x1xf32>
      %c0_35 = arith.constant 0 : index
      %c0_36 = arith.constant 0 : index
      %41 = vector.load %arg10[%c0_35, %c0_36] : memref<8x16xf32, #tpu.memory_space<vmem>>, vector<8x16xf32>
      %42 = vector.broadcast %40 : vector<8x1xf32> to vector<8x16xf32>
      %43 = arith.mulf %41, %42 : vector<8x16xf32>
      %c0_37 = arith.constant 0 : index
      %c0_38 = arith.constant 0 : index
      %c0_39 = arith.constant 0 : index
      %c0_40 = arith.constant 0 : index
      %44 = vector.load %arg7[%c0_37, %c0_38, %c0_39, %c0_40] : memref<1x1x8x16xf32, #tpu.memory_space<vmem>>, vector<1x1x8x16xf32>
      %45 = vector.shape_cast %44 : vector<1x1x8x16xf32> to vector<8x16xf32>
      %46 = vector.shape_cast %43 : vector<8x16xf32> to vector<1x1x8x16xf32>
      tpu.vector_store %arg7[%c0_37, %c0_38, %c0_39, %c0_40], %46 {strides = array<i32>} : memref<1x1x8x16xf32, #tpu.memory_space<vmem>>, vector<1x1x8x16xf32>,
    } else {
    }
    return
  }
  func.func @transform_0(%arg0: i32, %arg1: i32, %arg2: i32, %arg3: i32) -> (i32, i32, i32, i32, i32) {
    %c0_i32 = arith.constant 0 : i32
    %c0_i32_0 = arith.constant 0 : i32
    %c0_i32_1 = arith.constant 0 : i32
    return %c0_i32, %arg1, %arg0, %arg2, %c0_i32_0 : i32, i32, i32, i32, i32
  }
  func.func @transform_1(%arg0: i32, %arg1: i32, %arg2: i32, %arg3: i32) -> (i32, i32, i32, i32, i32) {
    %c1_i32 = arith.constant 1 : i32
    %c0_i32 = arith.constant 0 : i32
    %c0_i32_0 = arith.constant 0 : i32
    return %c1_i32, %arg1, %arg0, %arg3, %c0_i32 : i32, i32, i32, i32, i32
  }
  func.func @transform_2(%arg0: i32, %arg1: i32, %arg2: i32, %arg3: i32) -> (i32, i32, i32, i32, i32) {
    %c2_i32 = arith.constant 2 : i32
    %c0_i32 = arith.constant 0 : i32
    %c0_i32_0 = arith.constant 0 : i32
    return %c2_i32, %arg1, %arg0, %arg3, %c0_i32 : i32, i32, i32, i32, i32
  }
  func.func @transform_3(%arg0: i32, %arg1: i32, %arg2: i32, %arg3: i32) -> (i32, i32, i32, i32) {
    %c0_i32 = arith.constant 0 : i32
    %c0_i32_0 = arith.constant 0 : i32
    return %arg0, %arg1, %arg2, %c0_i32 : i32, i32, i32, i32
  }
}

module attributes {stable_mosaic.version = 11 : i64} {
  func.func @_qkv_proj_kernel(%arg0: i32, %arg1: i32, %arg2: i32, %arg3: i32, %arg4: memref<16x32xf32, #tpu.memory_space<vmem>>, %arg5: memref<1x1x32x16xf32, #tpu.memory_space<vmem>>, %arg6: memref<1x1x16x16xf32, #tpu.memory_space<vmem>>, %arg7: memref<16x16xf32, #tpu.memory_space<vmem>>) attributes {dimension_semantics = [#tpu.dimension_semantics<parallel>, #tpu.dimension_semantics<parallel>, #tpu.dimension_semantics<parallel>, #tpu.dimension_semantics<arbitrary>], iteration_bounds = array<i64: 3, 4, 1, 1>, scalar_prefetch = 0 : i64, scratch_operands = 1 : i64, tpu.core_type = #tpu.core_type<tc>, window_params = [{transform_indices = @transform_0, window_bounds = array<i64: 16, 32>}, {transform_indices = @transform_1, window_bounds = array<i64: 1, 1, 32, 16>}, {transform_indices = @transform_2, window_bounds = array<i64: 1, 1, 16, 16>}]} {
    %c0_i32 = arith.constant 0 : i32
    %0 = arith.cmpi eq, %arg3, %c0_i32 : i32
    %1 = arith.extui %0 : i1 to i32
    %c0_i32_0 = arith.constant 0 : i32
    %2 = arith.cmpi ne, %1, %c0_i32_0 : i32
    scf.if %2 {
      %cst_12 = arith.constant 0.000000e+00 : f32
      %13 = vector.broadcast %cst_12 : f32 to vector<16x16xf32>
      %c0_13 = arith.constant 0 : index
      %c0_14 = arith.constant 0 : index
      %14 = vector.load %arg7[%c0_13, %c0_14] : memref<16x16xf32, #tpu.memory_space<vmem>>, vector<16x16xf32>
      tpu.vector_store %arg7[%c0_13, %c0_14], %13 {strides = array<i32>} : memref<16x16xf32, #tpu.memory_space<vmem>>, vector<16x16xf32>,
    } else {
    }
    %c0 = arith.constant 0 : index
    %c0_1 = arith.constant 0 : index
    %3 = vector.load %arg7[%c0, %c0_1] : memref<16x16xf32, #tpu.memory_space<vmem>>, vector<16x16xf32>
    %c0_2 = arith.constant 0 : index
    %c0_3 = arith.constant 0 : index
    %4 = vector.load %arg4[%c0_2, %c0_3] : memref<16x32xf32, #tpu.memory_space<vmem>>, vector<16x32xf32>
    %c0_4 = arith.constant 0 : index
    %c0_5 = arith.constant 0 : index
    %c0_6 = arith.constant 0 : index
    %c0_7 = arith.constant 0 : index
    %5 = vector.load %arg5[%c0_4, %c0_5, %c0_6, %c0_7] : memref<1x1x32x16xf32, #tpu.memory_space<vmem>>, vector<1x1x32x16xf32>
    %6 = vector.shape_cast %5 : vector<1x1x32x16xf32> to vector<32x16xf32>
    %cst = arith.constant dense<0.000000e+00> : vector<16x16xf32>
    %7 = tpu.matmul %4, %6, %cst {dimension_numbers = #tpu.dot_dimension_numbers<[1], [0], [0], [1], [0, 0, 1, 1], [], []>} : vector<16x32xf32>, vector<32x16xf32>, vector<16x16xf32> -> vector<16x16xf32>
    %8 = arith.addf %3, %7 : vector<16x16xf32>
    %c0_8 = arith.constant 0 : index
    %c0_9 = arith.constant 0 : index
    %9 = vector.load %arg7[%c0_8, %c0_9] : memref<16x16xf32, #tpu.memory_space<vmem>>, vector<16x16xf32>
    tpu.vector_store %arg7[%c0_8, %c0_9], %8 {strides = array<i32>} : memref<16x16xf32, #tpu.memory_space<vmem>>, vector<16x16xf32>,
    %c0_i32_10 = arith.constant 0 : i32
    %10 = arith.cmpi eq, %arg3, %c0_i32_10 : i32
    %11 = arith.extui %10 : i1 to i32
    %c0_i32_11 = arith.constant 0 : i32
    %12 = arith.cmpi ne, %11, %c0_i32_11 : i32
    scf.if %12 {
      %c0_12 = arith.constant 0 : index
      %c0_13 = arith.constant 0 : index
      %13 = vector.load %arg7[%c0_12, %c0_13] : memref<16x16xf32, #tpu.memory_space<vmem>>, vector<16x16xf32>
      %c0_14 = arith.constant 0 : index
      %c0_15 = arith.constant 0 : index
      %c0_16 = arith.constant 0 : index
      %c0_17 = arith.constant 0 : index
      %14 = vector.load %arg6[%c0_14, %c0_15, %c0_16, %c0_17] : memref<1x1x16x16xf32, #tpu.memory_space<vmem>>, vector<1x1x16x16xf32>
      %15 = vector.shape_cast %14 : vector<1x1x16x16xf32> to vector<16x16xf32>
      %16 = vector.shape_cast %13 : vector<16x16xf32> to vector<1x1x16x16xf32>
      tpu.vector_store %arg6[%c0_14, %c0_15, %c0_16, %c0_17], %16 {strides = array<i32>} : memref<1x1x16x16xf32, #tpu.memory_space<vmem>>, vector<1x1x16x16xf32>,
    } else {
    }
    return
  }
  func.func @transform_0(%arg0: i32, %arg1: i32, %arg2: i32, %arg3: i32) -> (i32, i32) {
    %c0_i32 = arith.constant 0 : i32
    return %arg2, %arg3 : i32, i32
  }
  func.func @transform_1(%arg0: i32, %arg1: i32, %arg2: i32, %arg3: i32) -> (i32, i32, i32, i32) {
    %c0_i32 = arith.constant 0 : i32
    %c0_i32_0 = arith.constant 0 : i32
    return %arg0, %arg1, %arg3, %c0_i32 : i32, i32, i32, i32
  }
  func.func @transform_2(%arg0: i32, %arg1: i32, %arg2: i32, %arg3: i32) -> (i32, i32, i32, i32) {
    %c0_i32 = arith.constant 0 : i32
    %c0_i32_0 = arith.constant 0 : i32
    return %arg0, %arg1, %arg2, %c0_i32 : i32, i32, i32, i32
  }
}

module attributes {stable_mosaic.version = 11 : i64} {
  func.func @_out_proj_kernel(%arg0: i32, %arg1: i32, %arg2: i32, %arg3: i32, %arg4: memref<1x1x8x16xf32, #tpu.memory_space<vmem>>, %arg5: memref<1x16x32xf32, #tpu.memory_space<vmem>>, %arg6: memref<1x32xf32, #tpu.memory_space<vmem>>, %arg7: memref<1x8x32xf32, #tpu.memory_space<vmem>>, %arg8: memref<8x32xf32, #tpu.memory_space<vmem>>) attributes {dimension_semantics = [#tpu.dimension_semantics<parallel>, #tpu.dimension_semantics<parallel>, #tpu.dimension_semantics<parallel>, #tpu.dimension_semantics<arbitrary>], iteration_bounds = array<i64: 2, 1, 1, 4>, scalar_prefetch = 0 : i64, scratch_operands = 1 : i64, tpu.core_type = #tpu.core_type<tc>, window_params = [{transform_indices = @transform_0, window_bounds = array<i64: 1, 1, 8, 16>}, {transform_indices = @transform_1, window_bounds = array<i64: 1, 16, 32>}, {transform_indices = @transform_2, window_bounds = array<i64: 1, 32>}, {transform_indices = @transform_3, window_bounds = array<i64: 1, 8, 32>}]} {
    %c0_i32 = arith.constant 0 : i32
    %0 = arith.cmpi eq, %arg3, %c0_i32 : i32
    %1 = arith.extui %0 : i1 to i32
    %c0_i32_0 = arith.constant 0 : i32
    %2 = arith.cmpi ne, %1, %c0_i32_0 : i32
    scf.if %2 {
      %cst_12 = arith.constant 0.000000e+00 : f32
      %14 = vector.broadcast %cst_12 : f32 to vector<8x32xf32>
      %c0_13 = arith.constant 0 : index
      %c0_14 = arith.constant 0 : index
      %15 = vector.load %arg8[%c0_13, %c0_14] : memref<8x32xf32, #tpu.memory_space<vmem>>, vector<8x32xf32>
      tpu.vector_store %arg8[%c0_13, %c0_14], %14 {strides = array<i32>} : memref<8x32xf32, #tpu.memory_space<vmem>>, vector<8x32xf32>,
    } else {
    }
    %c0 = arith.constant 0 : index
    %c0_1 = arith.constant 0 : index
    %3 = vector.load %arg8[%c0, %c0_1] : memref<8x32xf32, #tpu.memory_space<vmem>>, vector<8x32xf32>
    %c0_2 = arith.constant 0 : index
    %c0_3 = arith.constant 0 : index
    %c0_4 = arith.constant 0 : index
    %c0_5 = arith.constant 0 : index
    %4 = vector.load %arg4[%c0_2, %c0_3, %c0_4, %c0_5] : memref<1x1x8x16xf32, #tpu.memory_space<vmem>>, vector<1x1x8x16xf32>
    %5 = vector.shape_cast %4 : vector<1x1x8x16xf32> to vector<8x16xf32>
    %c0_6 = arith.constant 0 : index
    %c0_7 = arith.constant 0 : index
    %c0_8 = arith.constant 0 : index
    %6 = vector.load %arg5[%c0_6, %c0_7, %c0_8] : memref<1x16x32xf32, #tpu.memory_space<vmem>>, vector<1x16x32xf32>
    %7 = vector.shape_cast %6 : vector<1x16x32xf32> to vector<16x32xf32>
    %cst = arith.constant dense<0.000000e+00> : vector<8x32xf32>
    %8 = tpu.matmul %5, %7, %cst {dimension_numbers = #tpu.dot_dimension_numbers<[1], [0], [0], [1], [0, 0, 1, 1], [], []>} : vector<8x16xf32>, vector<16x32xf32>, vector<8x32xf32> -> vector<8x32xf32>
    %9 = arith.addf %3, %8 : vector<8x32xf32>
    %c0_9 = arith.constant 0 : index
    %c0_10 = arith.constant 0 : index
    %10 = vector.load %arg8[%c0_9, %c0_10] : memref<8x32xf32, #tpu.memory_space<vmem>>, vector<8x32xf32>
    tpu.vector_store %arg8[%c0_9, %c0_10], %9 {strides = array<i32>} : memref<8x32xf32, #tpu.memory_space<vmem>>, vector<8x32xf32>,
    %c3_i32 = arith.constant 3 : i32
    %11 = arith.cmpi eq, %arg3, %c3_i32 : i32
    %12 = arith.extui %11 : i1 to i32
    %c0_i32_11 = arith.constant 0 : i32
    %13 = arith.cmpi ne, %12, %c0_i32_11 : i32
    scf.if %13 {
      %c0_12 = arith.constant 0 : index
      %c0_13 = arith.constant 0 : index
      %14 = vector.load %arg8[%c0_12, %c0_13] : memref<8x32xf32, #tpu.memory_space<vmem>>, vector<8x32xf32>
      %c0_14 = arith.constant 0 : index
      %c0_15 = arith.constant 0 : index
      %15 = vector.load %arg6[%c0_14, %c0_15] : memref<1x32xf32, #tpu.memory_space<vmem>>, vector<1x32xf32>
      %16 = vector.broadcast %15 : vector<1x32xf32> to vector<8x32xf32>
      %17 = arith.addf %14, %16 : vector<8x32xf32>
      %c0_16 = arith.constant 0 : index
      %c0_17 = arith.constant 0 : index
      %c0_18 = arith.constant 0 : index
      %18 = vector.load %arg7[%c0_16, %c0_17, %c0_18] : memref<1x8x32xf32, #tpu.memory_space<vmem>>, vector<1x8x32xf32>
      %19 = vector.shape_cast %18 : vector<1x8x32xf32> to vector<8x32xf32>
      %20 = vector.shape_cast %17 : vector<8x32xf32> to vector<1x8x32xf32>
      tpu.vector_store %arg7[%c0_16, %c0_17, %c0_18], %20 {strides = array<i32>} : memref<1x8x32xf32, #tpu.memory_space<vmem>>, vector<1x8x32xf32>,
    } else {
    }
    return
  }
  func.func @transform_0(%arg0: i32, %arg1: i32, %arg2: i32, %arg3: i32) -> (i32, i32, i32, i32) {
    %c0_i32 = arith.constant 0 : i32
    %c0_i32_0 = arith.constant 0 : i32
    return %arg0, %arg3, %arg1, %c0_i32 : i32, i32, i32, i32
  }
  func.func @transform_1(%arg0: i32, %arg1: i32, %arg2: i32, %arg3: i32) -> (i32, i32, i32) {
    %c0_i32 = arith.constant 0 : i32
    %c0_i32_0 = arith.constant 0 : i32
    return %arg3, %c0_i32, %arg2 : i32, i32, i32
  }
  func.func @transform_2(%arg0: i32, %arg1: i32, %arg2: i32, %arg3: i32) -> (i32, i32) {
    %c0_i32 = arith.constant 0 : i32
    %c0_i32_0 = arith.constant 0 : i32
    return %c0_i32, %arg2 : i32, i32
  }
  func.func @transform_3(%arg0: i32, %arg1: i32, %arg2: i32, %arg3: i32) -> (i32, i32, i32) {
    %c0_i32 = arith.constant 0 : i32
    return %arg0, %arg1, %arg2 : i32, i32, i32
  }
}

</mosaic_0001>

<bundles_post_ra>
// kernel: attention_forward.4
= control target key start
LH: loop header
LB: loop body
LE: loop exit
PB: predicated region body
PF: predicated region fallthrough
CT: control target
= control target key end

     0   :  { %s841_s12 = smov 0   ;;  %s843_s13 = smov 0   ;;  %s918_s0 = inlined_call_operand.vmem [shape: f32[3,4,2,8,16], index: 0, kind: input, shape index: {}, may-alias: {0,1,2}]   ;;  %s919_s1 = inlined_call_operand.vmem [shape: f32[3,4,2,8,16], index: 1, kind: input, shape index: {}, may-alias: {0,1,2}]   ;;  %s920_s2 = inlined_call_operand.vmem [shape: f32[3,4,2,8,16], index: 2, kind: input, shape index: {}, may-alias: {0,1,2}]   ;;  %s921_s3 = inlined_call_operand.vmem [shape: f32[2,4,8,16], index: 3, kind: output, shape index: {}]  }
   0x1   :  { %s845_s14 = smov 0   ;;  %s847_s15 = smov 0  }
   0x2   :  { %s849_s16 = smov 0  }
   0x3 LB: > { %s35_s17 = sadd.s32 1, %s807_s14  ;;  %s39_s18 = sadd.s32 1, %s811_s15  ;;  %s815_s16 = sphi %s849_s16, %s13_s16   ;;  %s811_s15 = sphi %s847_s15, %s925_s15   ;;  %s807_s14 = sphi %s845_s14, %s924_s14   ;;  %s803_s13 = sphi %s843_s13, %s923_s13   ;;  %s799_s12 = sphi %s841_s12, %s922_s12  }
   0x4   : > { %p37_p0 = scmp.ge.s32.totalorder %s35_s17, 4  ;;  %p695_p1 = scmp.ge.s32.totalorder %s815_s16, 1 }
   0x5   : > { %p219_p2 = scmp.lt.s32.totalorder %s815_s16, 9 }
   0x6   : > { %s927_s17 = smov (%p37_p0, %s35_s17), 0  ;;  %s929_s18 = smov (!%p37_p0, %s39_s18), %s811_s15 }
   0x7   : > { %p220_p3 = pnand %p695_p1, %p219_p2  ;;  %p41_p4 = scmp.ge.s32.totalorder %s929_s18, 2 }
   0x8   : > { %p279_p5 = scmp.lt.s32.totalorder (!%p220_p3), %s799_s12, 3  ;;  %p281_p6 = scmp.lt.s32.totalorder (!%p220_p3), %s803_s13, 1  ;;  %vm332_vm0 = vcmask (!%p220_p3), 130048   ;;  %v817_v0 = vmov (!%p220_p3), 0.0   ;;  %vm818_vm1 = vmmov (!%p220_p3), 0   ;;  %vm329_vm2 = vcmask (!%p220_p3), 7168  }
   0x9   : > { %s931_s18 = smov (%p41_p4, %s929_s18), 0  ;;  %223 = sbr.rel (%p220_p3) target bundleno = 826 (0x33a), region = 32 }
   0xa   : > { %715 = vmatprep.subr.mxu0 (!%p220_p3), %v817_v0  ;;  %333 = vst.msk [vmem:[#allocation4] sm:$0xff] (!%p220_p3), %vm332_vm0, %v817_v0  ;;  %717 = vmatprep.mubr.msk.f32.mxu0 (!%p220_p3), %vm818_vm1, %v817_v0  ;;  %v819_v3 = vmov (!%p220_p3), -inf   ;;  %vm415_vm3 = vcmask (!%p220_p3), 64512   ;;  %v820_v7 = vmov (!%p220_p3), 0  }
   0xb   : > { %720 = vmatprep.subr.mxu1 (!%p220_p3), %v817_v0  ;;  %722 = vmatprep.mubr.msk.f32.mxu1 (!%p220_p3), %vm818_vm1, %v817_v0  ;;  %330 = vst.msk [vmem:[#allocation2] sm:$0xff] (!%p220_p3), %vm329_vm2, %v819_v3  ;;  %331 = vst.msk [vmem:[#allocation3] sm:$0xff] (!%p220_p3), %vm329_vm2, %v817_v0 }
   0xc   : > { %769 = vset.pattern.permute.xlu0 (!%p220_p3), %v820_v7  ;;  %770 = vset.pattern.permute.xlu1 (!%p220_p3), %v820_v7 }
  0x10   : > { %s933_s12 = smov (!%p279_p5, %s799_s12), 3  ;;  %s935_s13 = smov (!%p281_p6, %s803_s13), 1 }
  0x11   : > { %s696_s19 = sshll.u32 %s933_s12, 1  ;;  %v512_v29 = vld [vmem:[#allocation4] sm:$0xff]  ;;  %s702_s4 = sshll.u32 %s935_s13, 2 }
  0x12   : > { %s287_s20 = sadd.s32 %s696_s19, %s935_s13  ;;  %v414_v8 = vld [vmem:[#allocation2] sm:$0xff]  ;;  %v431_v20 = vld [vmem:[#allocation3] sm:$0xff]  ;;  %s322_s5 = sadd.s32 %s702_s4, %s933_s12 }
  0x13   : > { %s697_s21 = sshll.u32 %s287_s20, 3  ;;  %s703_s6 = sshll.u32 %s322_s5, 3 }
  0x14   : > { %s619_s24 = scalar_lea.vmem %s919_s1, %s697_s21  ;;  %s289_s27 = scalar_lea.vmem %s918_s0, %s697_s21 }
  0x15   : > { %v704_v1 = vld [vmem:[%s619_s24 + $0x40] sm:$0xff]  ;;  %s625_s30 = scalar_lea.vmem %s920_s2, %s697_s21  ;;  %s324_s9 = scalar_lea.vmem %s921_s3, %s703_s6 }
  0x16   : > { %716 = vmatpush3.xpose.msk.msra.mxu0 %vm332_vm0, %v704_v1  ;;  %v334_v2 = vld [vmem:[%s289_s27] sm:$0xff] }
  0x17   : > { %v705_v12 = vld [vmem:[%s625_s30 + $0x80] sm:$0xff] }
  0x18   : > { %721 = vmatpush3.msra.mxu1 %v705_v12 }
  0x19   : > { %718 = vmatmul.mubr.msk.f32.vlgmr.msra.gmra.mrb[0].mxu0 %vm332_vm0, %v334_v2 }
  0xec   : > { %v410_v4 = vpop.f32.mrb[0].mxu0 }
  0xed   : > { %v719_v5 = vpop.f32.mrb[1].mxu0  ;;  %v416_v6 = vsel %vm415_vm3, %v410_v4, -inf }
  0xee   : > { %417 = vmax.xlane.f32.xlu0 %v416_v6 }
 0x17b   : > { %v418_v9 = vpop.xlane.xlu0 %417 }
 0x17c   : > { %v419_v10 = vmax.f32 %v414_v8, %v418_v9 }
 0x17e   : > { %v420_v11 = vsub.f32 %v414_v8, %v419_v10  ;;  %521 = vst.msk [vmem:[#allocation2] sm:$0xff] %vm329_vm2, %v419_v10  ;;  %425 = vperm.xlu0 %769, %v419_v10  }
 0x180   : > { %v421_v18 = vmul.f32 1.442695, %v420_v11 }
 0x1fd   : > { %v426_v13 = vpop.permute.xlu0 %425 }
 0x1fe   : > { %v428_v14 = vsub.f32 %v410_v4, %v426_v13 }
 0x200   : > { %v429_v15 = vmul.f32 1.442695, %v428_v14 }
 0x202   : > { %771 = vpow2.f32 %v429_v15 }
 0x203   : > { %773 = vpow2.f32 %v421_v18 }
 0x20c   : > { %v772_v16 = vpop.eup %771 }
 0x20d   : > { %723 = vmatmul.mubr.msk.f32.vlgmr.msra.gmra.mrb[0].mxu1 %vm415_vm3, %v772_v16  ;;  %v433_v17 = vsel %vm415_vm3, %v772_v16, 0.0  ;;  %v774_v19 = vpop.eup %773 }
 0x20e   : > { %434 = vadd.xlane.f32.xlu1 %v433_v17  ;;  %v432_v21 = vmul.f32 %v774_v19, %v431_v20 }
 0x21f   : > { %515 = vperm.xlu1 %770, %v774_v19  }
 0x29b   : > { %v435_v22 = vpop.xlane.xlu1 %434 }
 0x29c   : > { %v436_v23 = vadd.f32 %v435_v22, %v432_v21 }
 0x29e   : > { %438 = vst.msk [vmem:[#allocation3] sm:$0xff] %vm329_vm2, %v436_v23 }
 0x29f   : > { %v516_v30 = vpop.permute.xlu1 %515 }
 0x2a0   : > { %v518_v31 = vmul.f32 %v516_v30, %v512_v29 }
 0x2a5   : > { %v525_v24 = vld [vmem:[#allocation3] sm:$0xff] }
 0x2a6   : > { %775 = vrcp.f32 %v525_v24 }
 0x2b0   : > { %v776_v25 = vpop.eup %775 }
 0x2b1   : > { %v527_v26 = vmul.f32 %v776_v25, %v525_v24 }
 0x2b3   : > { %v528_v27 = vsub.f32 2.0, %v527_v26 }
 0x2b5   : > { %v529_v28 = vmul.f32 %v776_v25, %v528_v27 }
 0x2b7   : > { %533 = vperm.xlu1 %770, %v529_v28  }
 0x2e0   : > { %v508_v32 = vpop.f32.mrb[0].mxu1 }
 0x2e1   : > { %v519_v33 = vadd.f32 %v518_v31, %v508_v32  ;;  %v724_v34 = vpop.f32.mrb[1].mxu1 }
 0x2e3   : > { %520 = vst.msk [vmem:[#allocation4] sm:$0xff] %vm332_vm0, %v519_v33 }
 0x2ea   : > { %v530_v35 = vld [vmem:[#allocation4] sm:$0xff] }
 0x336   : > { %v534_v36 = vpop.permute.xlu1 %533 }
 0x337   : > { %v536_v37 = vmul.f32 %v534_v36, %v530_v35 }
 0x339   : > { %537 = vst.msk [vmem:[%s324_s9] sm:$0xff] %vm332_vm0, %v536_v37 }
 0x33a PF: > { %s13_s16 = sadd.s32 1, %s815_s16   ;;  %s922_s12 = smov %s807_s14 }
 0x33b   : > { %p10_p7 = scmp.ge.s32.totalorder %s13_s16, 10   ;;  %s923_s13 = smov %s811_s15 }
 0x33c   : > { %s924_s14 = smov %s927_s17  ;;  %s925_s15 = smov %s931_s18 }
 0x33d   :  { %12 = sbr.rel (!%p10_p7) target bundleno = 3 (0x3), region = 76 }

// kernel: attention_forward.3
= control target key start
LH: loop header
LB: loop body
LE: loop exit
PB: predicated region body
PF: predicated region fallthrough
CT: control target
= control target key end

     0   :  { %s637_s9 = smov 0   ;;  %s639_s10 = smov 0   ;;  %s702_s0 = inlined_call_operand.vmem [shape: f32[16,32], index: 0, kind: input, shape index: {}]   ;;  %s703_s1 = inlined_call_operand.vmem [shape: f32[3,4,32,16], index: 1, kind: input, shape index: {}]   ;;  %s704_s2 = inlined_call_operand.vmem [shape: f32[3,4,16,16], index: 2, kind: output, shape index: {}]  }
   0x1   :  { %s641_s11 = smov 0   ;;  %s643_s12 = smov 0  }
   0x2   :  { %s645_s13 = smov 0  }
   0x3 LB: > { %s34_s14 = sadd.s32 1, %s611_s11  ;;  %s38_s15 = sadd.s32 1, %s615_s12  ;;  %s619_s13 = sphi %s645_s13, %s12_s13   ;;  %s615_s12 = sphi %s643_s12, %s708_s12   ;;  %s611_s11 = sphi %s641_s11, %s707_s11   ;;  %s607_s10 = sphi %s639_s10, %s706_s10   ;;  %s603_s9 = sphi %s637_s9, %s705_s9  }
   0x4   : > { %p36_p0 = scmp.ge.s32.totalorder %s34_s14, 4  ;;  %p504_p1 = scmp.ge.s32.totalorder %s619_s13, 1 }
   0x5   : > { %p171_p2 = scmp.lt.s32.totalorder %s619_s13, 13 }
   0x6   : > { %s710_s14 = smov (%p36_p0, %s34_s14), 0  ;;  %s712_s15 = smov (!%p36_p0, %s38_s15), %s615_s12 }
   0x7   : > { %p172_p3 = pnand %p504_p1, %p171_p2  ;;  %p40_p4 = scmp.ge.s32.totalorder %s712_s15, 3 }
   0x8   : > { %p227_p5 = scmp.lt.s32.totalorder (!%p172_p3), %s607_s10, 2  ;;  %p229_p6 = scmp.lt.s32.totalorder (!%p172_p3), %s603_s9, 3  ;;  %v263_v0 = vld [vmem:[%s702_s0] sm:$0xff] (!%p172_p3)  ;;  %vm269_vm0 = vcmask (!%p172_p3), 261120   ;;  %vm258_vm1 = vcmask (!%p172_p3), 130048   ;;  %v621_v1 = vmov (!%p172_p3), 0.0  }
   0x9   : > { %s714_s15 = smov (%p40_p4, %s712_s15), 0  ;;  %175 = sbr.rel (%p172_p3) target bundleno = 257 (0x101), region = 28 }
   0xa   : > { %529 = vmatprep.mubr.msk.f32.mxu0 (!%p172_p3), %vm269_vm0, %v263_v0  ;;  %260 = vst.msk [vmem:[#allocation2 + $0x8] sm:$0xff] (!%p172_p3), %vm258_vm1, %v621_v1  ;;  %259 = vst.msk [vmem:[#allocation2] sm:$0xff] (!%p172_p3), %vm258_vm1, %v621_v1  ;;  %v264_v8 = vld [vmem:[%s702_s0 + $0x8] sm:$0xff] (!%p172_p3) }
  0x10   : > { %s716_s10 = smov (!%p227_p5, %s607_s10), 2  ;;  %s718_s9 = smov (!%p229_p6, %s603_s9), 3 }
  0x11   : > { %s506_s18 = sshll.u32 %s716_s10, 4  ;;  %s509_s19 = sshll.u32 %s716_s10, 3  ;;  %v262_v9 = vld [vmem:[#allocation2 + $0x8] sm:$0xff]  ;;  %v261_v10 = vld [vmem:[#allocation2] sm:$0xff] }
  0x12   : > { %s505_s20 = sshll.u32 %s718_s9, 2  ;;  %s508_s21 = sshll.u32 %s718_s9, 1 }
  0x13   : > { %s236_s22 = sadd.s32 %s506_s18, %s505_s20  ;;  %s250_s23 = sadd.s32 %s509_s19, %s508_s21 }
  0x14   : > { %s507_s24 = sshll.u32 %s236_s22, 3  ;;  %s510_s30 = sshll.u32 %s250_s23, 3 }
  0x15   : > { %s238_s27 = scalar_lea.vmem %s703_s1, %s507_s24  ;;  %s252_s5 = scalar_lea.vmem %s704_s2, %s510_s30 }
  0x16   : > { %v265_v2 = vld [vmem:[%s238_s27] sm:$0xff]  ;;  %v266_v3 = vld [vmem:[%s238_s27 + $0x8] sm:$0xff]  ;;  %v267_v4 = vld [vmem:[%s238_s27 + $0x10] sm:$0xff] }
  0x17   : > { %v532_v5 = vpack.c.bf16 %v266_v3, %v265_v2  ;;  %v268_v6 = vld [vmem:[%s238_s27 + $0x18] sm:$0xff] }
  0x18   : > { %v536_v7 = vpack.c.bf16 %v268_v6, %v267_v4 }
  0x19   : > { %533 = vmatprep.subr.bf16.mxu0 %v532_v5 }
  0x1a   : > { %535 = vmatpush3.bf16.msra.mxu0 %v532_v5 }
  0x1b   : > { %537 = vmatprep.subr.bf16.mxu0 %v536_v7 }
  0x1e   : > { %539 = vmatpush3.bf16.msra.mxu0 %v536_v7 }
  0x21   : > { %530 = vmatmul.mubr.msk.f32.vlgmr.msra.gmra.mrb[0].mxu0 %vm269_vm0, %v264_v8 }
  0xf4   : > { %v531_v11 = vpop.f32.mrb[0].mxu0 }
  0xf5   : > { %v352_v12 = vadd.f32 %v531_v11, %v262_v9  ;;  %v342_v13 = vpop.f32.mrb[1].mxu0 }
  0xf6   : > { %v351_v14 = vadd.f32 %v342_v13, %v261_v10 }
  0xf7   : > { %355 = vst.msk [vmem:[#allocation2 + $0x8] sm:$0xff] %vm258_vm1, %v352_v12 }
  0xf8   : > { %354 = vst.msk [vmem:[#allocation2] sm:$0xff] %vm258_vm1, %v351_v14 }
  0xfe   : > { %v360_v15 = vld [vmem:[#allocation2 + $0x8] sm:$0xff] }
  0xff   : > { %362 = vst.msk [vmem:[%s252_s5 + $0x8] sm:$0xff] %vm258_vm1, %v360_v15  ;;  %v359_v16 = vld [vmem:[#allocation2] sm:$0xff] }
 0x100   : > { %361 = vst.msk [vmem:[%s252_s5] sm:$0xff] %vm258_vm1, %v359_v16 }
 0x101 PF: > { %s12_s13 = sadd.s32 1, %s619_s13   ;;  %s705_s9 = smov %s611_s11 }
 0x102   : > { %p9_p7 = scmp.ge.s32.totalorder %s12_s13, 14   ;;  %s706_s10 = smov %s615_s12 }
 0x103   : > { %s707_s11 = smov %s710_s14  ;;  %s708_s12 = smov %s714_s15 }
 0x104   :  { %11 = sbr.rel (!%p9_p7) target bundleno = 3 (0x3), region = 69 }

// kernel: attention_forward.5
= control target key start
LH: loop header
LB: loop body
LE: loop exit
PB: predicated region body
PF: predicated region fallthrough
CT: control target
= control target key end

     0   :  { %8 = vsyncpa [#allocation4], 0  ;;  %s876_s0 = inlined_call_operand.vmem [shape: f32[2,4,8,16], index: 0, kind: input, shape index: {}]   ;;  %s877_s1 = inlined_call_operand.vmem [shape: f32[4,16,32], index: 1, kind: input, shape index: {}]   ;;  %s878_s2 = inlined_call_operand.vmem [shape: f32[1,32], index: 2, kind: input, shape index: {}]   ;;  %s879_s3 = inlined_call_operand.hbm [shape: f32[2,8,32], index: 3, kind: output, shape index: {}]  }
   0x1   :  { %10 = vsyncpa [#allocation4 + $0x1], 0  ;;  %s729_s12 = smov 0   ;;  %s731_s13 = smov 0  }
   0x2   :  { %s733_s14 = smov 0   ;;  %s735_s15 = smov 0  }
   0x3   :  { %s737_s16 = smov 0   ;;  %s739_s17 = smov 0  }
   0x4   :  { %s741_s18 = smov 0   ;;  %s743_s19 = smov 0  }
   0x5 LB: > { %s500_s20 = sadd.s32 4294967295, %s702_s19   ;;  %s501_s21 = sadd.s32 4294967294, %s702_s19   ;;  %s702_s19 = sphi %s743_s19, %s16_s19   ;;  %s698_s18 = sphi %s741_s18, %s891_s18   ;;  %s694_s17 = sphi %s739_s17, %s890_s17   ;;  %s690_s16 = sphi %s737_s16, %s889_s16   ;;  %s686_s15 = sphi %s735_s15, %s888_s15   ;;  %s682_s14 = sphi %s733_s14, %s887_s14   ;;  %s678_s13 = sphi %s731_s13, %s886_s13   ;;  %s674_s12 = sphi %s729_s12, %s885_s12  }
   0x6   : > { %s31_s22 = sadd.s32 1, %s694_s17  ;;  %s42_s23 = sadd.s32 1, %s698_s18 }
   0x7   : > { %p32_p0 = scmp.ge.s32.totalorder %s31_s22, 4  ;;  %p147_p1 = scmp.ne.s32.totalorder %s682_s14, %s678_s13 }
   0x8   : > { %p148_p2 = scmp.eq.s32.totalorder %s500_s20, 7  ;;  %p153_p4 = scmp.ne.s32.totalorder %s678_s13, %s674_s12 }
   0x9   : > { %s893_s22 = smov (%p32_p0, %s31_s22), 0  ;;  %s895_s23 = smov (!%p32_p0, %s42_s23), %s698_s18 }
   0xa   : > { %p778_p3 = por %p148_p2, %p147_p1  ;;  %p44_p5 = scmp.ge.s32.totalorder %s895_s23, 2 }
   0xb   : > { %p154_p6 = scmp.eq.s32.totalorder %s501_s21, 7  ;;  %p505_p7 = scmp.ge.s32.totalorder %s702_s19, 1 }
   0xc   : > { %p203_p8 = scmp.lt.s32.totalorder %s702_s19, 9  ;;  %s897_s23 = smov (%p44_p5, %s895_s23), 0 }
   0xd   : > { %882 = sst [smem:[#allocation6_spill]] %s897_s23  ;;  %p788_p9 = por %p154_p6, %p153_p4 }
   0xe   : > { %p204_p10 = pnand %p505_p7, %p203_p8  ;;  %s130_s26 = ssub.s32 %s698_s18, %s897_s23 }
   0xf   : > { %s137_s27 = sadd.s32 1, %s682_s14  ;;  %p135_p11 = scmp.eq.s32.totalorder %s130_s26, 0 }
  0x10   : > { %207 = sbr.rel (%p204_p10) target bundleno = 287 (0x11f), region = 32  ;;  %s241_s29 = sand.u32 (!%p204_p10), 1, %s678_s13  }
  0x11   : > { %s796_s28 = scalar_select %p135_p11, %s682_s14, %s137_s27  }
  0x12   : > { %p244_p12 = scmp.lt.s32.totalorder (!%p204_p10), %s690_s16, 1  ;;  %s802_s30 = sshll.u32 (!%p204_p10), %s241_s29, 3 }
  0x13   : > { %p246_p13 = scmp.lt.s32.totalorder (!%p204_p10), %s686_s15, 3  ;;  %s243_s23 = scalar_lea.vmem (!%p204_p10), [#allocation3], %s802_s30 }
  0x14   : > { %p511_p0 = scmp.ne.s32.totalorder (!%p204_p10), %s686_s15, 0 }
  0x17   : > { %s245_s4 = scalar_select %p244_p12, %s690_s16, 1 }
  0x18   : > { %s247_s5 = scalar_select %p246_p13, %s686_s15, 3 }
  0x19   : > { %s507_s6 = sshll.u32 %s245_s4, 2  ;;  %269 = sbr.rel (%p511_p0) target bundleno = 32 (0x20), region = 36  ;;  %vm270_vm0 = vcmask (!%p511_p0), 261120   ;;  %v704_v0 = vmov (!%p511_p0), 0.0  }
  0x1a   : > { %s252_s7 = sadd.s32 %s507_s6, %s247_s5  ;;  %s519_s8 = sshll.u32 %s247_s5, 4  ;;  %271 = vst.msk [vmem:[#allocation2] sm:$0xff] (!%p511_p0), %vm270_vm0, %v704_v0 }
  0x1b   : > { %s508_s9 = sshll.u32 %s252_s7, 3  ;;  %s262_s20 = scalar_lea.vmem %s877_s1, %s519_s8 }
  0x1c   : > { %s254_s27 = scalar_lea.vmem %s876_s0, %s508_s9 }
  0x20 PF: > { %v274_v1 = vld [vmem:[%s262_s20] sm:$0xff]  ;;  %v275_v2 = vld [vmem:[%s262_s20 + $0x8] sm:$0xff]  ;;  %v705_v3 = vmov 0.0|0.0   ;;  %vm706_vm1 = vmmov 0   ;;  %v707_v5 = vmov 0.0   ;;  %vm276_vm2 = vcmask 130048  }
  0x21   : > { %530 = vmatprep.subr.bf16.mxu0 %v705_v3  ;;  %v531_v4 = vpack.c.bf16 %v275_v2, %v274_v1  ;;  %527 = vmatprep.mubr.msk.f32.mxu0 %vm706_vm1, %v707_v5  ;;  %v273_v6 = vld [vmem:[%s254_s27] sm:$0xff]  ;;  %vm351_vm3 = vcmask 261120   ;;  %p513_p1 = scmp.ne.s32.totalorder %s686_s15, 3 }
  0x22   : > { %v272_v7 = vld [vmem:[#allocation2] sm:$0xff] }
  0x23   : > { %532 = vmatpush3.bf16.msra.mxu0 %v531_v4  ;;  %v514_v12 = vld [vmem:[%s878_s2] ss:$0 sm:$0xff] (!%p513_p1) }
  0x26   : > { %528 = vmatmul.mubr.msk.f32.vlgmr.msra.gmra.mrb[0].mxu0 %vm276_vm2, %v273_v6 }
  0xf6   : > { %356 = sbr.rel (%p513_p1) target bundleno = 263 (0x107), region = 40 }
  0xf9   : > { %v346_v8 = vpop.f32.mrb[0].mxu0 }
  0xfa   : > { %v350_v9 = vadd.f32 %v346_v8, %v272_v7  ;;  %v529_v10 = vpop.f32.mrb[1].mxu0 }
  0xfc   : > { %352 = vst.msk [vmem:[#allocation2] sm:$0xff] %vm351_vm3, %v350_v9 }
 0x103   : > { %v357_v11 = vld [vmem:[#allocation2] sm:$0xff] }
 0x104   : > { %v365_v13 = vadd.f32 %v514_v12, %v357_v11 }
 0x106   : > { %366 = vst.msk [vmem:[%s243_s23] sm:$0xff] %vm351_vm3, %v365_v13 }
 0x107 PF: > { %s516_s6 = sshll.u32 %s690_s16, 7  ;;  %s383_s9 = sshll.u32 %s243_s23, 4  ;;  %s384_s9 = int_to_ptr.vmem [resolvable:$true] %s383_s9 }
 0x108   : > { %s825_s15 = scalar_lea.hbm %s879_s3, %s516_s6  ;;  %s368_s10 = scalar_lea.sflag [#allocation4], %s241_s29 }
 0x109   : > { %s608_s11 = scalar_lea.vmem %s384_s9, 128  ;;  %s708_s20 = smov [#allocation3]  }
 0x10a   : > { %p609_p2 = scmp.ne.s32.totalorder %s384_s9, %s608_s11  ;;  %s612_s21 = sshll.u32 %s708_s20, 4  ;;  %s613_s21 = int_to_ptr.vmem [resolvable:$false] %s612_s21 }
 0x10b   : > { %s614_s26 = scalar_lea.vmem %s613_s21, 256  ;;  %p615_p6 = scmp.lt.s32.totalorder %s384_s9, %s613_s21 }
 0x10c   : > { %p610_p4 = pnand %p609_p2, %p778_p3  ;;  %p616_p7 = scmp.lt.s32.totalorder %s614_s26, %s608_s11 }
 0x10e   : > { %p611_p5 = pneg %p610_p4  ;;  %p617_p8 = por %p616_p7, %p615_p6 }
 0x110   : > { %p618_p10 = pnand %p617_p8, %p611_p5 }
 0x112   : > { %621 = shalt.err (!%p618_p10)
}
 0x113   : > { %s622_s16 = scalar_lea.hbm %s825_s15, 128  ;;  %s626_s30 = scalar_lea.hbm %s879_s3, 256 }
 0x114   : > { %p623_p11 = scmp.ne.s32.totalorder %s825_s15, %s622_s16  ;;  %p627_p0 = scmp.lt.u32.totalorder %s825_s15, %s879_s3 }
 0x115   : > { %p628_p1 = scmp.lt.u32.totalorder %s626_s30, %s622_s16  ;;  %p630_p4 = scmp.lt.u32.totalorder %s622_s16, %s825_s15 }
 0x116   : > { %p624_p12 = pnand %p623_p11, %p778_p3 }
 0x117   : > { %p629_p2 = por %p628_p1, %p627_p0 }
 0x118   : > { %p625_p13 = pneg %p624_p12 }
 0x119   : > { %p631_p5 = por %p630_p4, %p629_p2 }
 0x11b   : > { %p632_p6 = pnand %p631_p5, %p625_p13 }
 0x11d   : > { %635 = shalt.err (!%p632_p6)
}
 0x11e   : > { %533 = dma.vmem_to_hbm [thread:$0]  (%p778_p3), %s384_s9, 128, %s825_s15, %s368_s10  }
 0x11f PF: > { %p539_p7 = scmp.ge.s32.totalorder %s702_s19, 2  ;;  %s395_s5 = sand.u32 1, %s674_s12  }
 0x120   : > { %s396_s6 = scalar_lea.sflag [#allocation4], %s395_s5 }
 0x121   : > { %p536_p8 = pnand %p539_p7, %p788_p9 }
 0x123   : > { %669 = dma.done.wait (!%p536_p8), %s396_s6, 128  }
 0x124   : > { %671 = vsyncadd (!%p536_p8), %s396_s6, 4294967168  ;;  %s16_s19 = sadd.s32 1, %s702_s19   ;;  %s884_s24 = sld [smem:[#allocation6_spill]] }
 0x125   : > { %p13_p10 = scmp.ge.s32.totalorder %s16_s19, 10   ;;  %s885_s12 = smov %s678_s13 }
 0x126   : > { %s886_s13 = smov %s682_s14  ;;  %s887_s14 = smov %s796_s28 }
 0x127   : > { %s888_s15 = smov %s694_s17  ;;  %s889_s16 = smov %s698_s18 }
 0x128   : > { %s890_s17 = smov %s893_s22  ;;  %15 = sbr.rel (!%p13_p10) target bundleno = 5 (0x5), region = 81 }
 0x12a   : > { %s891_s18 = smov %s884_s24 }
 0x12f   :  { %401 = vsyncpa [#allocation4], 1 }
 0x130   :  { %403 = vsyncpa [#allocation4 + $0x1], 1 }

</bundles_post_ra>
